<compile_context>
chip_gen: v5e
topology: v5e:2x2
jax: 0.10.0
libtpu: 0.0.40
codegen_flags: <defaults>
</compile_context>

<pallas_src>
import functools

import jax
import jax.numpy as jnp
from jax import lax
from jax.experimental import pallas as pl
from jax.experimental.pallas import tpu as pltpu  # noqa: F401  (kept for TPU-specific extensions)


def _temperature_net_kernel(src_ref, tgt_ref, w_ref, vec_ref, out_ref, *, K, N):
    # src_ref/tgt_ref: [B, K*N]; w_ref: [3, N, N]; vec_ref: [8, N] packed as
    #   row 0: g1, row 1: beta1, row 2: g2, row 3: beta2, row 4: b3, rows 5-7: pad
    eps = 1e-5
    B = out_ref.shape[0]
    inv_k = 1.0 / K
    inv_b = 1.0 / B

    # ---- |mean_K(src - tgt)| via K lane-aligned static slices (VPU only) ----
    d = src_ref[...] - tgt_ref[...]                       # [B, K*N]
    acc = d[:, 0:N]
    for k in range(1, K):                                 # static trip count
        acc = acc + d[:, k * N:(k + 1) * N]
    x = jnp.abs(acc * inv_k)                              # [B, N]

    # ---- layer 1: Linear (bias cancelled by BN) -> BatchNorm1d -> ReLU ----
    h = jnp.dot(x, w_ref[0], preferred_element_type=jnp.float32)
    s1 = jnp.sum(h, axis=0, keepdims=True)
    s2 = jnp.sum(h * h, axis=0, keepdims=True)            # independent of s1
    mu = s1 * inv_b
    var = jnp.maximum(s2 * inv_b - mu * mu, 0.0)           # biased var, guarded
    scale = vec_ref[0:1, :] * lax.rsqrt(var + eps)
    shift = vec_ref[1:2, :] - mu * scale
    h = jnp.maximum(h * scale + shift, 0.0)

    # ---- layer 2: Linear (bias cancelled by BN) -> BatchNorm1d -> ReLU ----
    h = jnp.dot(h, w_ref[1], preferred_element_type=jnp.float32)
    s1 = jnp.sum(h, axis=0, keepdims=True)
    s2 = jnp.sum(h * h, axis=0, keepdims=True)
    mu = s1 * inv_b
    var = jnp.maximum(s2 * inv_b - mu * mu, 0.0)
    scale = vec_ref[2:3, :] * lax.rsqrt(var + eps)
    shift = vec_ref[3:4, :] - mu * scale
    h = jnp.maximum(h * scale + shift, 0.0)

    # ---- layer 3: Linear + bias; ReLU is subsumed by the clamp (0.05 > 0) ----
    h = jnp.dot(h, w_ref[2], preferred_element_type=jnp.float32) + vec_ref[4:5, :]
    out_ref[...] = jnp.clip(h, 1.0 / 20.0, 20.0)


def prepack_params(params):
    """Pack parameters once (outside the forward path).

    Returns:
      w_stack: [3, N, N]  (w1, w2, w3), each stored as [N_in, N_out]
      vec:     [8, N]     rows = g1, beta1, g2, beta2, b3, pad, pad, pad
    Note: b1/b2 are intentionally omitted — they are exactly cancelled by the
    training-mode BatchNorm mean subtraction.
    """
    N = params["w1"].shape[0]
    w_stack = jnp.stack([params["w1"], params["w2"], params["w3"]], axis=0)
    vec = jnp.concatenate(
        [
            params["g1"], params["beta1"],
            params["g2"], params["beta2"],
            params["b3"],
            jnp.zeros((3, N), jnp.float32),  # pad to 8 sublanes
        ],
        axis=0,
    )
    return w_stack, vec


@jax.jit
def temperature_net_high(src, tgt, w_stack, vec):
    """src, tgt: [B, K, N] float32. w_stack: [3,N,N], vec: [8,N] (pre-packed)."""
    B, K, N = src.shape
    assert tgt.shape == (B, K, N)

    # Free, contiguous reshape: [B, K, N] -> [B, K*N] (lane-dense, no transpose).
    src2 = src.reshape(B, K * N)
    tgt2 = tgt.reshape(B, K * N)

    kernel = functools.partial(_temperature_net_kernel, K=K, N=N)

    itemsize = 4
    cost = pl.CostEstimate(
        flops=2 * B * N * N * 3 + 24 * B * N,
        transcendentals=2 * N,
        bytes_accessed=(2 * B * K * N + 3 * N * N + 8 * N + B * N) * itemsize,
    )

    return pl.pallas_call(
        kernel,
        out_shape=jax.ShapeDtypeStruct((B, N), jnp.float32),
        cost_estimate=cost,
    )(src2, tgt2, w_stack, vec)


def init_params(key, num_preserved_point):
    """Parameter init mimicking nn.Linear / nn.BatchNorm1d shapes.

    Linear weights are stored pre-transposed as [N_in, N_out] so the kernel
    computes y = x @ W + b (equivalent to PyTorch's x @ weight.T + bias).
    Per-feature vectors (bias, gamma, beta) are stored as [1, N].
    """
    N = num_preserved_point
    keys = jax.random.split(key, 6)
    bound = 1.0 / jnp.sqrt(N)

    def lin(kw, kb):
        w = jax.random.uniform(kw, (N, N), jnp.float32, -bound, bound)
        b = jax.random.uniform(kb, (1, N), jnp.float32, -bound, bound)
        return w, b

    w1, b1 = lin(keys[0], keys[1])
    w2, b2 = lin(keys[2], keys[3])
    w3, b3 = lin(keys[4], keys[5])

    ones = jnp.ones((1, N), jnp.float32)
    zeros = jnp.zeros((1, N), jnp.float32)
    return {
        "w1": w1, "b1": b1, "g1": ones, "beta1": zeros,
        "w2": w2, "b2": b2, "g2": ones, "beta2": zeros,
        "w3": w3, "b3": b3,
    }


def _reference(src, tgt, p):
    """Pure-JAX reference of the PyTorch forward (training-mode BatchNorm).

    Keeps the b1/b2 biases to verify the kernel's exact BN-cancellation.
    """
    eps = 1e-5
    x = jnp.abs(src.mean(axis=1) - tgt.mean(axis=1))

    h = x @ p["w1"] + p["b1"]
    mu = h.mean(axis=0, keepdims=True)
    var = ((h - mu) ** 2).mean(axis=0, keepdims=True)
    h = jnp.maximum((h - mu) / jnp.sqrt(var + eps) * p["g1"] + p["beta1"], 0.0)

    h = h @ p["w2"] + p["b2"]
    mu = h.mean(axis=0, keepdims=True)
    var = ((h - mu) ** 2).mean(axis=0, keepdims=True)
    h = jnp.maximum((h - mu) / jnp.sqrt(var + eps) * p["g2"] + p["beta2"], 0.0)

    h = jnp.maximum(h @ p["w3"] + p["b3"], 0.0)
    return jnp.clip(h, 1.0 / 20.0, 20.0)


if __name__ == "__main__":
    B, K, N = 8, 4, 128  # batch, points-to-average (dim=1), num_preserved_point

    key = jax.random.PRNGKey(0)
    k_src, k_tgt, k_par = jax.random.split(key, 3)

    src = jax.random.normal(k_src, (B, K, N), jnp.float32)
    tgt = jax.random.normal(k_tgt, (B, K, N), jnp.float32)
    params = init_params(k_par, N)

    # Pack once, outside the forward path (constant data).
    w_stack, vec = prepack_params(params)
    w_stack = jax.block_until_ready(w_stack)
    vec = jax.block_until_ready(vec)

    out = temperature_net_high(src, tgt, w_stack, vec)
    out = jax.block_until_ready(out)

    ref = _reference(src, tgt, params)
    assert out.shape == (B, N)
    assert jnp.allclose(out, ref, atol=1e-4, rtol=1e-4), "mismatch vs reference"

    print("KERNEL_OK")
</pallas_src>

<mosaic_0001>
module attributes {stable_mosaic.version = 11 : i64} {
  func.func @_temperature_net_kernel(%arg0: memref<8x512xf32, #tpu.memory_space<vmem>>, %arg1: memref<8x512xf32, #tpu.memory_space<vmem>>, %arg2: memref<3x128x128xf32, #tpu.memory_space<vmem>>, %arg3: memref<8x128xf32, #tpu.memory_space<vmem>>, %arg4: memref<8x128xf32, #tpu.memory_space<vmem>>) attributes {dimension_semantics = [], scalar_prefetch = 0 : i64, scratch_operands = 0 : i64, tpu.core_type = #tpu.core_type<tc>} {
    %c0 = arith.constant 0 : index
    %c0_0 = arith.constant 0 : index
    %0 = vector.load %arg0[%c0, %c0_0] : memref<8x512xf32, #tpu.memory_space<vmem>>, vector<8x512xf32>
    %c0_1 = arith.constant 0 : index
    %c0_2 = arith.constant 0 : index
    %1 = vector.load %arg1[%c0_1, %c0_2] : memref<8x512xf32, #tpu.memory_space<vmem>>, vector<8x512xf32>
    %2 = arith.subf %0, %1 : vector<8x512xf32>
    %3 = vector.extract_strided_slice %2 {offsets = [0, 0], sizes = [8, 128], strides = [1, 1]} : vector<8x512xf32> to vector<8x128xf32>
    %4 = vector.extract_strided_slice %2 {offsets = [0, 128], sizes = [8, 128], strides = [1, 1]} : vector<8x512xf32> to vector<8x128xf32>
    %5 = arith.addf %3, %4 : vector<8x128xf32>
    %6 = vector.extract_strided_slice %2 {offsets = [0, 256], sizes = [8, 128], strides = [1, 1]} : vector<8x512xf32> to vector<8x128xf32>
    %7 = arith.addf %5, %6 : vector<8x128xf32>
    %8 = vector.extract_strided_slice %2 {offsets = [0, 384], sizes = [8, 128], strides = [1, 1]} : vector<8x512xf32> to vector<8x128xf32>
    %9 = arith.addf %7, %8 : vector<8x128xf32>
    %cst = arith.constant 2.500000e-01 : f32
    %10 = vector.broadcast %cst : f32 to vector<8x128xf32>
    %11 = arith.mulf %9, %10 : vector<8x128xf32>
    %12 = math.absf %11 : vector<8x128xf32>
    %c0_3 = arith.constant 0 : index
    %c0_4 = arith.constant 0 : index
    %c0_5 = arith.constant 0 : index
    %13 = vector.load %arg2[%c0_3, %c0_4, %c0_5] : memref<3x128x128xf32, #tpu.memory_space<vmem>>, vector<1x128x128xf32>
    %14 = vector.shape_cast %13 : vector<1x128x128xf32> to vector<128x128xf32>
    %cst_6 = arith.constant dense<0.000000e+00> : vector<8x128xf32>
    %15 = tpu.matmul %12, %14, %cst_6 {dimension_numbers = #tpu.dot_dimension_numbers<[1], [0], [0], [1], [0, 0, 1, 1], [], []>} : vector<8x128xf32>, vector<128x128xf32>, vector<8x128xf32> -> vector<8x128xf32>
    %cst_7 = arith.constant dense<0.000000e+00> : vector<128xf32>
    %16 = vector.multi_reduction <add>, %15, %cst_7 [0] : vector<8x128xf32> to vector<128xf32>
    %17 = vector.shape_cast %16 : vector<128xf32> to vector<1x128xf32>
    %18 = arith.mulf %15, %15 : vector<8x128xf32>
    %cst_8 = arith.constant dense<0.000000e+00> : vector<128xf32>
    %19 = vector.multi_reduction <add>, %18, %cst_8 [0] : vector<8x128xf32> to vector<128xf32>
    %20 = vector.shape_cast %19 : vector<128xf32> to vector<1x128xf32>
    %cst_9 = arith.constant 1.250000e-01 : f32
    %21 = vector.broadcast %cst_9 : f32 to vector<1x128xf32>
    %22 = arith.mulf %17, %21 : vector<1x128xf32>
    %cst_10 = arith.constant 1.250000e-01 : f32
    %23 = vector.broadcast %cst_10 : f32 to vector<1x128xf32>
    %24 = arith.mulf %20, %23 : vector<1x128xf32>
    %25 = arith.mulf %22, %22 : vector<1x128xf32>
    %26 = arith.subf %24, %25 : vector<1x128xf32>
    %cst_11 = arith.constant 0.000000e+00 : f32
    %27 = vector.broadcast %cst_11 : f32 to vector<1x128xf32>
    %28 = arith.maximumf %26, %27 : vector<1x128xf32>
    %c0_12 = arith.constant 0 : index
    %c0_13 = arith.constant 0 : index
    %29 = vector.load %arg3[%c0_12, %c0_13] : memref<8x128xf32, #tpu.memory_space<vmem>>, vector<1x128xf32>
    %cst_14 = arith.constant 9.99999974E-6 : f32
    %30 = vector.broadcast %cst_14 : f32 to vector<1x128xf32>
    %31 = arith.addf %28, %30 : vector<1x128xf32>
    %32 = math.rsqrt %31 : vector<1x128xf32>
    %33 = arith.mulf %29, %32 : vector<1x128xf32>
    %c1 = arith.constant 1 : index
    %c0_15 = arith.constant 0 : index
    %34 = vector.load %arg3[%c1, %c0_15] : memref<8x128xf32, #tpu.memory_space<vmem>>, vector<1x128xf32>
    %35 = arith.mulf %22, %33 : vector<1x128xf32>
    %36 = arith.subf %34, %35 : vector<1x128xf32>
    %37 = vector.broadcast %33 : vector<1x128xf32> to vector<8x128xf32>
    %38 = arith.mulf %15, %37 : vector<8x128xf32>
    %39 = vector.broadcast %36 : vector<1x128xf32> to vector<8x128xf32>
    %40 = arith.addf %38, %39 : vector<8x128xf32>
    %cst_16 = arith.constant 0.000000e+00 : f32
    %41 = vector.broadcast %cst_16 : f32 to vector<8x128xf32>
    %42 = arith.maximumf %40, %41 : vector<8x128xf32>
    %c1_17 = arith.constant 1 : index
    %c0_18 = arith.constant 0 : index
    %c0_19 = arith.constant 0 : index
    %43 = vector.load %arg2[%c1_17, %c0_18, %c0_19] : memref<3x128x128xf32, #tpu.memory_space<vmem>>, vector<1x128x128xf32>
    %44 = vector.shape_cast %43 : vector<1x128x128xf32> to vector<128x128xf32>
    %cst_20 = arith.constant dense<0.000000e+00> : vector<8x128xf32>
    %45 = tpu.matmul %42, %44, %cst_20 {dimension_numbers = #tpu.dot_dimension_numbers<[1], [0], [0], [1], [0, 0, 1, 1], [], []>} : vector<8x128xf32>, vector<128x128xf32>, vector<8x128xf32> -> vector<8x128xf32>
    %cst_21 = arith.constant dense<0.000000e+00> : vector<128xf32>
    %46 = vector.multi_reduction <add>, %45, %cst_21 [0] : vector<8x128xf32> to vector<128xf32>
    %47 = vector.shape_cast %46 : vector<128xf32> to vector<1x128xf32>
    %48 = arith.mulf %45, %45 : vector<8x128xf32>
    %cst_22 = arith.constant dense<0.000000e+00> : vector<128xf32>
    %49 = vector.multi_reduction <add>, %48, %cst_22 [0] : vector<8x128xf32> to vector<128xf32>
    %50 = vector.shape_cast %49 : vector<128xf32> to vector<1x128xf32>
    %cst_23 = arith.constant 1.250000e-01 : f32
    %51 = vector.broadcast %cst_23 : f32 to vector<1x128xf32>
    %52 = arith.mulf %47, %51 : vector<1x128xf32>
    %cst_24 = arith.constant 1.250000e-01 : f32
    %53 = vector.broadcast %cst_24 : f32 to vector<1x128xf32>
    %54 = arith.mulf %50, %53 : vector<1x128xf32>
    %55 = arith.mulf %52, %52 : vector<1x128xf32>
    %56 = arith.subf %54, %55 : vector<1x128xf32>
    %cst_25 = arith.constant 0.000000e+00 : f32
    %57 = vector.broadcast %cst_25 : f32 to vector<1x128xf32>
    %58 = arith.maximumf %56, %57 : vector<1x128xf32>
    %c2 = arith.constant 2 : index
    %c0_26 = arith.constant 0 : index
    %59 = vector.load %arg3[%c2, %c0_26] : memref<8x128xf32, #tpu.memory_space<vmem>>, vector<1x128xf32>
    %cst_27 = arith.constant 9.99999974E-6 : f32
    %60 = vector.broadcast %cst_27 : f32 to vector<1x128xf32>
    %61 = arith.addf %58, %60 : vector<1x128xf32>
    %62 = math.rsqrt %61 : vector<1x128xf32>
    %63 = arith.mulf %59, %62 : vector<1x128xf32>
    %c3 = arith.constant 3 : index
    %c0_28 = arith.constant 0 : index
    %64 = vector.load %arg3[%c3, %c0_28] : memref<8x128xf32, #tpu.memory_space<vmem>>, vector<1x128xf32>
    %65 = arith.mulf %52, %63 : vector<1x128xf32>
    %66 = arith.subf %64, %65 : vector<1x128xf32>
    %67 = vector.broadcast %63 : vector<1x128xf32> to vector<8x128xf32>
    %68 = arith.mulf %45, %67 : vector<8x128xf32>
    %69 = vector.broadcast %66 : vector<1x128xf32> to vector<8x128xf32>
    %70 = arith.addf %68, %69 : vector<8x128xf32>
    %cst_29 = arith.constant 0.000000e+00 : f32
    %71 = vector.broadcast %cst_29 : f32 to vector<8x128xf32>
    %72 = arith.maximumf %70, %71 : vector<8x128xf32>
    %c2_30 = arith.constant 2 : index
    %c0_31 = arith.constant 0 : index
    %c0_32 = arith.constant 0 : index
    %73 = vector.load %arg2[%c2_30, %c0_31, %c0_32] : memref<3x128x128xf32, #tpu.memory_space<vmem>>, vector<1x128x128xf32>
    %74 = vector.shape_cast %73 : vector<1x128x128xf32> to vector<128x128xf32>
    %cst_33 = arith.constant dense<0.000000e+00> : vector<8x128xf32>
    %75 = tpu.matmul %72, %74, %cst_33 {dimension_numbers = #tpu.dot_dimension_numbers<[1], [0], [0], [1], [0, 0, 1, 1], [], []>} : vector<8x128xf32>, vector<128x128xf32>, vector<8x128xf32> -> vector<8x128xf32>
    %c4 = arith.constant 4 : index
    %c0_34 = arith.constant 0 : index
    %76 = vector.load %arg3[%c4, %c0_34] : memref<8x128xf32, #tpu.memory_space<vmem>>, vector<1x128xf32>
    %77 = vector.broadcast %76 : vector<1x128xf32> to vector<8x128xf32>
    %78 = arith.addf %75, %77 : vector<8x128xf32>
    %cst_35 = arith.constant 5.000000e-02 : f32
    %cst_36 = arith.constant 2.000000e+01 : f32
    %79 = vector.broadcast %cst_35 : f32 to vector<8x128xf32>
    %80 = arith.maximumf %79, %78 : vector<8x128xf32>
    %81 = vector.broadcast %cst_36 : f32 to vector<8x128xf32>
    %82 = arith.minimumf %81, %80 : vector<8x128xf32>
    %c0_37 = arith.constant 0 : index
    %c0_38 = arith.constant 0 : index
    %83 = vector.load %arg4[%c0_37, %c0_38] : memref<8x128xf32, #tpu.memory_space<vmem>>, vector<8x128xf32>
    tpu.vector_store %arg4[%c0_37, %c0_38], %82 {strides = array<i32>} : memref<8x128xf32, #tpu.memory_space<vmem>>, vector<8x128xf32>,
    return
  }
}

</mosaic_0001>

<bundles_post_ra>
// kernel: temperature_net_high.1
= control target key start
LH: loop header
LB: loop body
LE: loop exit
PB: predicated region body
PF: predicated region fallthrough
CT: control target
= control target key end

     0   :  { %9 = vsyncpa [#allocation3], 0  ;;  %s396_s0 = inlined_call_operand.vmem [shape: f32[8,512], index: 0, kind: input, shape index: {}]   ;;  %s397_s1 = inlined_call_operand.vmem [shape: f32[8,512], index: 1, kind: input, shape index: {}]   ;;  %s398_s2 = inlined_call_operand.hbm [shape: f32[3,128,128], index: 2, kind: input, shape index: {}]   ;;  %s399_s3 = inlined_call_operand.vmem [shape: f32[8,128], index: 3, kind: input, shape index: {}]   ;;  %s400_s4 = inlined_call_operand.hbm [shape: f32[8,128], index: 4, kind: output, shape index: {}]  }
   0x1   :  { %10 = vsyncpa [#allocation4], 0  ;;  %s19_s17 = sshll.u32 %s398_s2, 4  ;;  %s322_s18 = smov [#allocation2]   ;;  %s20_s17 = int_to_ptr.hbm [resolvable:$true] %s19_s17 }
   0x2   :  { %s21_s19 = sshll.u32 %s322_s18, 4  ;;  %s323_s20 = smov 128   ;;  %s22_s19 = int_to_ptr.vmem [resolvable:$true] %s21_s19 }
   0x3   :  { %s324_s21 = smov 8  }
   0x4   :  { %27 = dma.hbm_to_vmem [thread:$0]  %s20_s17, 6144, %s22_s19, [#allocation3], %s323_s20, %s323_s20, %s324_s21  }
   0x5   :  { %318 = dma.done.wait [#allocation3], 6144  }
   0x6   :  { %319 = vsyncadd [#allocation3], 4294961152  ;;  %v66_v0 = vld [vmem:[#allocation2 + $0x78] sm:$0xff]  ;;  %v65_v1 = vld [vmem:[#allocation2 + $0x70] sm:$0xff]  ;;  %s325_s19 = smov [#allocation5]   ;;  %s251_s23 = sshll.u32 %s400_s4, 4  ;;  %s252_s23 = int_to_ptr.hbm [resolvable:$true] %s251_s23 }
   0x7   :  { %67 = vmatpush.msra.mxu0 %v66_v0  ;;  %v64_v2 = vld [vmem:[#allocation2 + $0x68] sm:$0xff]  ;;  %v63_v3 = vld [vmem:[#allocation2 + $0x60] sm:$0xff]  ;;  %v62_v6 = vld [vmem:[#allocation2 + $0x58] sm:$0xff]  ;;  %s249_s20 = sshll.u32 %s325_s19, 4  ;;  %s250_s20 = int_to_ptr.vmem [resolvable:$true] %s249_s20 }
   0x8   :  { %v34_v4 = vld [vmem:[%s396_s0] sm:$0xff]  ;;  %v35_v5 = vld [vmem:[%s396_s0 + $0x8] sm:$0xff]  ;;  %v61_v9 = vld [vmem:[#allocation2 + $0x50] sm:$0xff] }
   0x9   :  { %68 = vmatpush.msra.mxu0 %v65_v1  ;;  %v38_v7 = vld [vmem:[%s397_s1] sm:$0xff]  ;;  %v39_v8 = vld [vmem:[%s397_s1 + $0x8] sm:$0xff]  ;;  %v36_v12 = vld [vmem:[%s396_s0 + $0x10] sm:$0xff] }
   0xa   :  { %v42_v10 = vsub.f32 %v34_v4, %v38_v7  ;;  %v43_v11 = vsub.f32 %v35_v5, %v39_v8  ;;  %v40_v13 = vld [vmem:[%s397_s1 + $0x10] sm:$0xff]  ;;  %v60_v14 = vld [vmem:[#allocation2 + $0x48] sm:$0xff]  ;;  %v59_v15 = vld [vmem:[#allocation2 + $0x40] sm:$0xff] }
   0xb   :  { %69 = vmatpush.msra.mxu0 %v64_v2  ;;  %v44_v16 = vsub.f32 %v36_v12, %v40_v13  ;;  %v37_v18 = vld [vmem:[%s396_s0 + $0x18] sm:$0xff]  ;;  %v57_v21 = vld [vmem:[#allocation2 + $0x30] sm:$0xff]  ;;  %v56_v24 = vld [vmem:[#allocation2 + $0x28] sm:$0xff] }
   0xc   :  { %v46_v17 = vadd.f32 %v43_v11, %v42_v10  ;;  %v41_v19 = vld [vmem:[%s397_s1 + $0x18] sm:$0xff]  ;;  %v55_v25 = vld [vmem:[#allocation2 + $0x20] sm:$0xff]  ;;  %v53_v28 = vld [vmem:[#allocation2 + $0x10] sm:$0xff] }
   0xd   :  { %70 = vmatpush.msra.mxu0 %v63_v3  ;;  %v58_v20 = vld [vmem:[#allocation2 + $0x38] sm:$0xff]  ;;  %v45_v22 = vsub.f32 %v37_v18, %v41_v19  ;;  %v52_v30 = vld [vmem:[#allocation2 + $0x8] sm:$0xff]  ;;  %v51_v31 = vld [vmem:[#allocation2] sm:$0xff] }
   0xe   :  { %v47_v23 = vadd.f32 %v46_v17, %v44_v16  ;;  %v54_v27 = vld [vmem:[#allocation2 + $0x18] sm:$0xff]  ;;  %v141_v34 = vld [vmem:[#allocation2 + $0xf0] sm:$0xff]  ;;  %v140_v35 = vld [vmem:[#allocation2 + $0xe8] sm:$0xff] }
   0xf   :  { %71 = vmatpush.msra.mxu0 %v62_v6  ;;  %v142_v33 = vld [vmem:[#allocation2 + $0xf8] sm:$0xff]  ;;  %v139_v36 = vld [vmem:[#allocation2 + $0xe0] sm:$0xff]  ;;  %v137_v38 = vld [vmem:[#allocation2 + $0xd0] sm:$0xff] }
  0x10   :  { %v48_v26 = vadd.f32 %v47_v23, %v45_v22  ;;  %143 = vmatpush.msra.mxu1 %v142_v33  ;;  %v138_v37 = vld [vmem:[#allocation2 + $0xd8] sm:$0xff]  ;;  %v136_v42 = vld [vmem:[#allocation2 + $0xc8] sm:$0xff]  ;;  %v135_v45 = vld [vmem:[#allocation2 + $0xc0] sm:$0xff] }
  0x11   :  { %72 = vmatpush.msra.mxu0 %v61_v9  ;;  %v134_v48 = vld [vmem:[#allocation2 + $0xb8] sm:$0xff]  ;;  %v133_v51 = vld [vmem:[#allocation2 + $0xb0] sm:$0xff]  ;;  %v132_v54 = vld [vmem:[#allocation2 + $0xa8] sm:$0xff] }
  0x12   :  { %v49_v29 = vmul.f32 0.25, %v48_v26  ;;  %144 = vmatpush.msra.mxu1 %v141_v34  ;;  %v131_v57 = vld [vmem:[#allocation2 + $0xa0] sm:$0xff]  ;;  %v130_v60 = vld [vmem:[#allocation2 + $0x98] sm:$0xff]  ;;  %v129_v61 = vld [vmem:[#allocation2 + $0x90] sm:$0xff] }
  0x13   :  { %73 = vmatpush.msra.mxu0 %v60_v14  ;;  %v128_v0 = vld [vmem:[#allocation2 + $0x88] sm:$0xff]  ;;  %v127_v2 = vld [vmem:[#allocation2 + $0x80] sm:$0xff]  ;;  %v218_v22 = vld [vmem:[#allocation2 + $0x178] sm:$0xff] }
  0x14   :  { %v50_v32 = vand.u32 2147483647, %v49_v29  ;;  %145 = vmatpush.msra.mxu1 %v140_v35  ;;  %v105_v10 = vld [vmem:[%s399_s3] sm:$0x1]  ;;  %v118_v14 = vld [vmem:[%s399_s3 + $0x1] sm:$0x1]  ;;  %221 = vmatpush.msra.mxu2 %v218_v22 }
  0x15   :  { %74 = vmatpush.msra.mxu0 %v59_v15  ;;  %v217_v23 = vld [vmem:[#allocation2 + $0x170] sm:$0xff]  ;;  %v214_v26 = vld [vmem:[#allocation2 + $0x158] sm:$0xff]  ;;  %v211_v34 = vld [vmem:[#allocation2 + $0x140] sm:$0xff] }
  0x16   :  { %146 = vmatpush.msra.mxu1 %v139_v36  ;;  %222 = vmatpush.msra.mxu2 %v217_v23 }
  0x17   :  { %75 = vmatpush.msra.mxu0 %v58_v20 }
  0x18   :  { %147 = vmatpush.msra.mxu1 %v138_v37  ;;  %v210_v37 = vld [vmem:[#allocation2 + $0x138] sm:$0xff] }
  0x19   :  { %76 = vmatpush.msra.mxu0 %v57_v21 }
  0x1a   :  { %148 = vmatpush.msra.mxu1 %v137_v38 }
  0x1b   :  { %77 = vmatpush.msra.mxu0 %v56_v24  ;;  %v216_v24 = vld [vmem:[#allocation2 + $0x168] sm:$0xff] }
  0x1c   :  { %149 = vmatpush.msra.mxu1 %v136_v42  ;;  %223 = vmatpush.msra.mxu2 %v216_v24 }
  0x1d   :  { %78 = vmatpush.msra.mxu0 %v55_v25  ;;  %v215_v25 = vld [vmem:[#allocation2 + $0x160] sm:$0xff] }
  0x1e   :  { %150 = vmatpush.msra.mxu1 %v135_v45  ;;  %224 = vmatpush.msra.mxu2 %v215_v25 }
  0x1f   :  { %79 = vmatpush.msra.mxu0 %v54_v27  ;;  %v213_v27 = vld [vmem:[#allocation2 + $0x150] sm:$0xff] }
  0x20   :  { %151 = vmatpush.msra.mxu1 %v134_v48  ;;  %225 = vmatpush.msra.mxu2 %v214_v26 }
  0x21   :  { %80 = vmatpush.msra.mxu0 %v53_v28 }
  0x22   :  { %152 = vmatpush.msra.mxu1 %v133_v51  ;;  %226 = vmatpush.msra.mxu2 %v213_v27 }
  0x23   :  { %81 = vmatpush.msra.mxu0 %v52_v30 }
  0x24   :  { %153 = vmatpush.msra.mxu1 %v132_v54 }
  0x25   :  { %82 = vmatpush.msra.mxu0 %v51_v31  ;;  %v212_v31 = vld [vmem:[#allocation2 + $0x148] sm:$0xff] }
  0x26   :  { %83 = vmatmul.f32.vlgmr.msra.gmra.mxu0 %v50_v32  ;;  %154 = vmatpush.msra.mxu1 %v131_v57 }
  0x27   :  { %227 = vmatpush.msra.mxu2 %v212_v31 }
  0x28   :  { %155 = vmatpush.msra.mxu1 %v130_v60 }
  0x29   :  { %228 = vmatpush.msra.mxu2 %v211_v34 }
  0x2a   :  { %156 = vmatpush.msra.mxu1 %v129_v61 }
  0x2b   :  { %229 = vmatpush.msra.mxu2 %v210_v37 }
  0x2c   :  { %157 = vmatpush.msra.mxu1 %v128_v0 }
  0x2e   :  { %158 = vmatpush.msra.mxu1 %v127_v2 }
  0xa3   :  { %v84_v39 = vpop.f32.mrf.mxu0 }
  0xa4   :  { %v87_v40 = vrot.slane %v84_v39, 4  ;;  %v93_v41 = vmul.f32 %v84_v39, %v84_v39 }
  0xa6   :  { %v88_v43 = vadd.f32 %v87_v40, %v84_v39  ;;  %v94_v44 = vrot.slane %v93_v41, 4  ;;  %v209_v40 = vld [vmem:[#allocation2 + $0x130] sm:$0xff] }
  0xa7   :  { %230 = vmatpush.msra.mxu2 %v209_v40 }
  0xa8   :  { %v89_v46 = vrot.slane %v88_v43, 2  ;;  %v95_v47 = vadd.f32 %v94_v44, %v93_v41 }
  0xaa   :  { %v90_v49 = vadd.f32 %v89_v46, %v88_v43  ;;  %v96_v50 = vrot.slane %v95_v47, 2  ;;  %v208_v43 = vld [vmem:[#allocation2 + $0x128] sm:$0xff]  ;;  %v207_v46 = vld [vmem:[#allocation2 + $0x120] sm:$0xff] }
  0xab   :  { %231 = vmatpush.msra.mxu2 %v208_v43 }
  0xac   :  { %v91_v52 = vrot.slane %v90_v49, 1  ;;  %v97_v53 = vadd.f32 %v96_v50, %v95_v47  ;;  %v205_v50 = vld [vmem:[#allocation2 + $0x110] sm:$0xff] }
  0xad   :  { %232 = vmatpush.msra.mxu2 %v207_v46 }
  0xae   :  { %v92_v55 = vadd.f32 %v91_v52, %v90_v49  ;;  %v98_v56 = vrot.slane %v97_v53, 1  ;;  %v206_v49 = vld [vmem:[#allocation2 + $0x118] sm:$0xff] }
  0xaf   :  { %233 = vmatpush.msra.mxu2 %v206_v49 }
  0xb0   :  { %v99_v58 = vadd.f32 %v98_v56, %v97_v53  ;;  %v100_v59 = vmul.f32 0.125, %v92_v55  ;;  %v204_v53 = vld [vmem:[#allocation2 + $0x108] sm:$0xff]  ;;  %v203_v55 = vld [vmem:[#allocation2 + $0x100] sm:$0xff] }
  0xb1   :  { %234 = vmatpush.msra.mxu2 %v205_v50 }
  0xb2   :  { %v101_v62 = vmul.f32 0.125, %v99_v58  ;;  %v102_v63 = vmul.f32 %v100_v59, %v100_v59 }
  0xb3   :  { %235 = vmatpush.msra.mxu2 %v204_v53 }
  0xb4   :  { %v103_v1 = vsub.f32 %v101_v62, %v102_v63  ;;  %v181_v63 = vld [vmem:[%s399_s3 + $0x2] sm:$0x1] }
  0xb5   :  { %236 = vmatpush.msra.mxu2 %v203_v55 }
  0xb6   :  { %v104_v3 = vmax.f32 %v103_v1, 0.0 }
  0xb8   :  { %v106_v4 = vadd.f32 1e-05, %v104_v3  ;;  %v194_v3 = vld [vmem:[%s399_s3 + $0x3] sm:$0x1] }
  0xba   :  { %266 = vrsqrt.f32 %v106_v4  ;;  %vm113_vm1 = vweird.f32 %v106_v4 }
  0xc0   :  { %v267_v5 = vpop.eup %266 }
  0xc1   :  { %v108_v6 = vmul.f32 %v267_v5, %v106_v4  ;;  %vm114_vm0 = vweird.f32 %v267_v5 }
  0xc2   :  { %vm115_vm2 = vmor %vm113_vm1, %vm114_vm0 }
  0xc3   :  { %v109_v7 = vmul.f32 %v267_v5, %v108_v6 }
  0xc5   :  { %v110_v8 = vmul.f32 0.5, %v109_v7 }
  0xc7   :  { %v111_v9 = vsub.f32 1.5, %v110_v8 }
  0xc9   :  { %v112_v11 = vmul.f32 %v267_v5, %v111_v9 }
  0xcb   :  { %v116_v12 = vsel %vm115_vm2, %v267_v5, %v112_v11  ;;  %v265_v11 = vld [vmem:[%s399_s3 + $0x4] ss:$0 sm:$0xff] }
  0xcc   :  { %v117_v13 = vmul.f32 %v116_v12, %v105_v10 }
  0xce   :  { %v121_v15 = vperm.slane %v117_v13, 0  ;;  %v119_v16 = vmul.f32 %v117_v13, %v100_v59 }
  0xd0   :  { %v120_v17 = vsub.f32 %v118_v14, %v119_v16  ;;  %v122_v18 = vmul.f32 %v121_v15, %v84_v39 }
  0xd2   :  { %v123_v19 = vperm.slane %v120_v17, 0 }
  0xd4   :  { %v124_v20 = vadd.f32 %v123_v19, %v122_v18 }
  0xd6   :  { %v125_v21 = vmax.f32 %v124_v20, 0.0 }
  0xd8   :  { %159 = vmatmul.f32.vlgmr.msra.gmra.mxu1 %v125_v21 }
 0x155   :  { %v160_v28 = vpop.f32.mrf.mxu1 }
 0x156   :  { %v163_v29 = vrot.slane %v160_v28, 4  ;;  %v169_v30 = vmul.f32 %v160_v28, %v160_v28 }
 0x158   :  { %v164_v32 = vadd.f32 %v163_v29, %v160_v28  ;;  %v170_v33 = vrot.slane %v169_v30, 4 }
 0x15a   :  { %v165_v35 = vrot.slane %v164_v32, 2  ;;  %v171_v36 = vadd.f32 %v170_v33, %v169_v30 }
 0x15c   :  { %v166_v38 = vadd.f32 %v165_v35, %v164_v32  ;;  %v172_v39 = vrot.slane %v171_v36, 2 }
 0x15e   :  { %v167_v41 = vrot.slane %v166_v38, 1  ;;  %v173_v42 = vadd.f32 %v172_v39, %v171_v36 }
 0x160   :  { %v168_v44 = vadd.f32 %v167_v41, %v166_v38  ;;  %v174_v45 = vrot.slane %v173_v42, 1 }
 0x162   :  { %v175_v47 = vadd.f32 %v174_v45, %v173_v42  ;;  %v176_v48 = vmul.f32 0.125, %v168_v44 }
 0x164   :  { %v177_v51 = vmul.f32 0.125, %v175_v47  ;;  %v178_v52 = vmul.f32 %v176_v48, %v176_v48 }
 0x166   :  { %v179_v54 = vsub.f32 %v177_v51, %v178_v52 }
 0x168   :  { %v180_v56 = vmax.f32 %v179_v54, 0.0 }
 0x16a   :  { %v182_v57 = vadd.f32 1e-05, %v180_v56 }
 0x16c   :  { %268 = vrsqrt.f32 %v182_v57  ;;  %vm189_vm4 = vweird.f32 %v182_v57 }
 0x172   :  { %v269_v58 = vpop.eup %268 }
 0x173   :  { %v184_v59 = vmul.f32 %v269_v58, %v182_v57  ;;  %vm190_vm3 = vweird.f32 %v269_v58 }
 0x174   :  { %vm191_vm5 = vmor %vm189_vm4, %vm190_vm3 }
 0x175   :  { %v185_v60 = vmul.f32 %v269_v58, %v184_v59 }
 0x177   :  { %v186_v61 = vmul.f32 0.5, %v185_v60 }
 0x179   :  { %v187_v62 = vsub.f32 1.5, %v186_v61 }
 0x17b   :  { %v188_v0 = vmul.f32 %v269_v58, %v187_v62 }
 0x17d   :  { %v192_v1 = vsel %vm191_vm5, %v269_v58, %v188_v0 }
 0x17e   :  { %v193_v2 = vmul.f32 %v192_v1, %v181_v63 }
 0x180   :  { %v197_v4 = vperm.slane %v193_v2, 0  ;;  %v195_v5 = vmul.f32 %v193_v2, %v176_v48 }
 0x182   :  { %v196_v6 = vsub.f32 %v194_v3, %v195_v5  ;;  %v198_v7 = vmul.f32 %v197_v4, %v160_v28 }
 0x184   :  { %v199_v8 = vperm.slane %v196_v6, 0 }
 0x186   :  { %v200_v9 = vadd.f32 %v199_v8, %v198_v7 }
 0x188   :  { %v201_v10 = vmax.f32 %v200_v9, 0.0 }
 0x18a   :  { %237 = vmatmul.f32.vlgmr.msra.gmra.mxu2 %v201_v10 }
 0x20d   :  { %v238_v12 = vpop.f32.mrf.mxu2 }
 0x20e   :  { %v239_v13 = vadd.f32 %v265_v11, %v238_v12 }
 0x210   :  { %v241_v14 = vmax.f32 %v239_v13, 0.05 }
 0x212   :  { %v242_v15 = vmin.f32 %v241_v14, 20.0 }
 0x214   :  { %243 = vst [vmem:[#allocation5] sm:$0xff] %v242_v15 }
 0x215   :  { %254 = dma.vmem_to_hbm [thread:$0]  %s250_s20, 128, %s252_s23, [#allocation4]  }
 0x216   :  { %320 = dma.done.wait [#allocation4], 128  }
 0x217   :  { %321 = vsyncadd [#allocation4], 4294967168 }
 0x218   :  { %259 = vsyncpa [#allocation3], 1 }
 0x219   :  { %260 = vsyncpa [#allocation4], 1 }

</bundles_post_ra>
